<compile_context>
chip_gen: v7x
topology: tpu7x:2x2x1
jax: 0.10.0
libtpu: 0.0.40
codegen_flags: <defaults>
</compile_context>

<pallas_src>
import functools

import jax
import jax.numpy as jnp
from jax import lax
from jax.experimental import pallas as pl
from jax.experimental.pallas import tpu as pltpu


# ---------------------------------------------------------------------------
# Kernel
# ---------------------------------------------------------------------------
def _make_kernel(has_bias: bool, has_lora: bool):
    """Build a matmul kernel: inputs = x, W(native), [mid, scaled B^T], [bias]."""

    def kernel(*args):
        idx = 0
        x_ref = args[idx]; idx += 1          # (tm, tk)
        w_ref = args[idx]; idx += 1          # (tn, tk)  native (out, in) layout
        if has_lora:
            mid_ref = args[idx]; idx += 1    # (tm, r_pad)   x @ A^T (precomputed)
            bts_ref = args[idx]; idx += 1    # (r_pad, tn)   scaling * B^T
        if has_bias:
            bias_ref = args[idx]; idx += 1   # (1, tn) f32
        o_ref = args[idx]; idx += 1          # (tm, tn)
        acc_ref = args[idx]                  # (tm, tn) f32 scratch

        k = pl.program_id(2)

        @pl.when(k == 0)
        def _init():
            if has_lora:
                # Seed with the full (pre-scaled) LoRA contribution for this tile.
                acc_ref[...] = jnp.dot(mid_ref[...], bts_ref[...],
                                       preferred_element_type=jnp.float32)
            else:
                acc_ref[...] = jnp.zeros_like(acc_ref)

        # Main matmul: x (tm,tk) contracted against native-layout W (tn,tk).
        acc_ref[...] += lax.dot_general(
            x_ref[...], w_ref[...],
            dimension_numbers=(((1,), (1,)), ((), ())),
            preferred_element_type=jnp.float32)

        @pl.when(k == pl.num_programs(2) - 1)
        def _write():
            acc = acc_ref[...]
            if has_bias:
                acc = acc + bias_ref[...]
            o_ref[...] = acc.astype(o_ref.dtype)

    return kernel


# ---------------------------------------------------------------------------
# Helpers
# ---------------------------------------------------------------------------
def _round_up(v, m):
    return ((v + m - 1) // m) * m


def _pad_to(arr, shape):
    pads = [(0, s - d) for d, s in zip(arr.shape, shape)]
    if any(p[1] for p in pads):
        return jnp.pad(arr, pads)
    return arr


# ---------------------------------------------------------------------------
# One-time weight preparation (cacheable outside the hot path)
# ---------------------------------------------------------------------------
def prepare_lora_linear(weight, bias, lora_A, lora_B, scaling, *,
                        compute_dtype=jnp.bfloat16,
                        tile_m=512, tile_n=512, tile_k=1024):
    """Cast / scale / pad the static parameters once. Reuse across calls."""
    out_f, in_f = weight.shape
    has_lora = (lora_A is not None) and (lora_A.shape[0] > 0)
    has_bias = bias is not None
    r = lora_A.shape[0] if has_lora else 0

    # Lane-dense N/K tiles; prefer 256-multiples (2x256x256 MXU) when the dim
    # is large enough, shrink to cover small dims without gross padding.
    tn = min(tile_n, _round_up(out_f, 256 if out_f > 128 else 128))
    tk = min(tile_k, _round_up(in_f, 256 if in_f > 128 else 128))
    Np = _round_up(out_f, tn)
    Kp = _round_up(in_f, tk)

    prep = dict(out_f=out_f, in_f=in_f, r=r,
                has_lora=has_lora, has_bias=has_bias,
                compute_dtype=compute_dtype, tile_m=tile_m,
                tn=tn, tk=tk, Np=Np, Kp=Kp)

    # Weight kept in native (out, in) layout -> no transpose materialization.
    prep["w_p"] = _pad_to(weight.astype(compute_dtype), (Np, Kp))

    if has_bias:
        prep["bias_p"] = _pad_to(
            bias.astype(jnp.float32).reshape(1, out_f), (1, Np))

    if has_lora:
        # Small rank padding: sublane-pack friendly (16 for 2-byte dtypes).
        r_pad = _round_up(r, 16 if jnp.dtype(compute_dtype).itemsize < 4 else 8)
        prep["r_pad"] = r_pad
        prep["a_t"] = lora_A.T.astype(compute_dtype)                  # (in_f, r)
        prep["bts_p"] = _pad_to(
            (lora_B.T.astype(jnp.float32) * scaling).astype(compute_dtype),
            (r_pad, Np))                                              # (r_pad, Np)
    return prep


# ---------------------------------------------------------------------------
# Hot path: only touches x (and the tiny (M, r) LoRA mid projection)
# ---------------------------------------------------------------------------
def lora_linear_apply(x, prep):
    out_f, in_f = prep["out_f"], prep["in_f"]
    cd = prep["compute_dtype"]
    has_lora, has_bias = prep["has_lora"], prep["has_bias"]
    tn, tk, Np, Kp = prep["tn"], prep["tk"], prep["Np"], prep["Kp"]

    lead = x.shape[:-1]
    x2 = x.reshape(-1, in_f).astype(cd)
    M = x2.shape[0]

    m_sub = 16 if jnp.dtype(cd).itemsize < 4 else 8
    tm = min(prep["tile_m"], _round_up(M, 256 if M > 128 else m_sub))
    Mp = _round_up(M, tm)

    x_p = _pad_to(x2, (Mp, Kp))

    in_specs = [
        pl.BlockSpec((tm, tk), lambda i, j, k: (i, k)),      # x
        pl.BlockSpec((tn, tk), lambda i, j, k: (j, k)),      # W (native layout)
    ]
    operands = [x_p, prep["w_p"]]

    if has_lora:
        r_pad = prep["r_pad"]
        # LoRA mid projection hoisted out of the kernel: tiny (M, r) matmul.
        mid = jnp.dot(x2, prep["a_t"], preferred_element_type=jnp.float32)
        mid_p = _pad_to(mid.astype(cd), (Mp, r_pad))
        in_specs += [
            pl.BlockSpec((tm, r_pad), lambda i, j, k: (i, 0)),   # mid
            pl.BlockSpec((r_pad, tn), lambda i, j, k: (0, j)),   # scaled B^T
        ]
        operands += [mid_p, prep["bts_p"]]
    if has_bias:
        in_specs += [pl.BlockSpec((1, tn), lambda i, j, k: (0, j))]
        operands += [prep["bias_p"]]

    grid = (Mp // tm, Np // tn, Kp // tk)

    out_itemsize = jnp.dtype(x.dtype).itemsize
    cd_itemsize = jnp.dtype(cd).itemsize
    flops = 2 * M * out_f * in_f + 2 * M * out_f * prep.get("r_pad", 0)
    bytes_accessed = (x_p.size * cd_itemsize * (Np // tn)
                      + prep["w_p"].size * cd_itemsize * (Mp // tm)
                      + Mp * Np * out_itemsize)
    cost = pl.CostEstimate(flops=flops, transcendentals=0,
                           bytes_accessed=bytes_accessed)

    # Double-buffered VMEM footprint; only raise the scoped-VMEM limit when the
    # chosen tiles actually need it (defaults stay within every generation).
    vmem_est = (2 * (tm * tk + tn * tk) * cd_itemsize      # x + W buffers
                + 2 * tm * tn * out_itemsize               # output buffers
                + 4 * tm * tn)                              # f32 accumulator
    cp_kwargs = dict(dimension_semantics=("parallel", "parallel", "arbitrary"))
    if vmem_est > 24 * 1024 * 1024:
        cp_kwargs["vmem_limit_bytes"] = min(100 * 1024 * 1024,
                                            int(vmem_est * 1.5))

    out = pl.pallas_call(
        _make_kernel(has_bias, has_lora),
        out_shape=jax.ShapeDtypeStruct((Mp, Np), x.dtype),
        grid_spec=pltpu.PrefetchScalarGridSpec(
            num_scalar_prefetch=0,
            grid=grid,
            in_specs=in_specs,
            out_specs=pl.BlockSpec((tm, tn), lambda i, j, k: (i, j)),
            scratch_shapes=[pltpu.VMEM((tm, tn), jnp.float32)],
        ),
        compiler_params=pltpu.CompilerParams(**cp_kwargs),
        cost_estimate=cost,
    )(*operands)

    return out[:M, :out_f].reshape(*lead, out_f)


def lora_linear(x, weight, bias, lora_A, lora_B, scaling, **kwargs):
    """Convenience one-shot wrapper (prepare + apply every call)."""
    prep = prepare_lora_linear(weight, bias, lora_A, lora_B, scaling, **kwargs)
    return lora_linear_apply(x, prep)


# ---------------------------------------------------------------------------
# Demo / correctness check
# ---------------------------------------------------------------------------
if __name__ == "__main__":
    # Small shapes consistent with the module: batch=2, seq=8, in=32, out=64, r=8
    batch, seq, in_features, out_features, r, lora_alpha = 2, 8, 32, 64, 8, 32
    scaling = lora_alpha / r

    key = jax.random.PRNGKey(0)
    k_x, k_w, k_b, k_a, k_lb = jax.random.split(key, 5)

    x = jax.random.normal(k_x, (batch, seq, in_features), dtype=jnp.float32)
    weight = jax.random.normal(k_w, (out_features, in_features),
                               dtype=jnp.float32) * 0.05
    bias = jax.random.normal(k_b, (out_features,), dtype=jnp.float32) * 0.01
    # NOTE: reset_parameters() with 'kaiming_uniform' zeroes lora_B; we use small
    # nonzero values here so the LoRA matmul path is actually exercised.
    lora_A = jax.random.normal(k_a, (r, in_features), dtype=jnp.float32) * 0.1
    lora_B = jax.random.normal(k_lb, (out_features, r), dtype=jnp.float32) * 0.1
    # TODO(synk): lora_dropout with p>0 (stateful RNG dropout) not implemented;
    # LoraLinear defaults to p=0.0 so dropout is the identity here.

    # pure-JAX reference
    y_ref = (x @ weight.T + bias) + (x @ lora_A.T @ lora_B.T) * scaling

    # f32 compute path (tight correctness check)
    y32 = lora_linear(x, weight, bias, lora_A, lora_B, scaling,
                      compute_dtype=jnp.float32)
    y32 = jax.block_until_ready(y32)
    assert y32.shape == (batch, seq, out_features)
    assert jnp.allclose(y32, y_ref, atol=1e-4, rtol=1e-4), "f32 mismatch vs reference"

    # Default bf16 compute path (MXU peak, f32 accumulation), with the weight
    # prep cached once and the apply hot path reused.
    prep = prepare_lora_linear(weight, bias, lora_A, lora_B, scaling)
    y16 = jax.block_until_ready(lora_linear_apply(x, prep))
    y16b = jax.block_until_ready(lora_linear_apply(x, prep))   # reuse cached prep
    assert jnp.allclose(y16, y_ref, atol=5e-2, rtol=5e-2), "bf16 mismatch vs reference"
    assert jnp.allclose(y16, y16b), "prepared-path mismatch across calls"

    # r == 0 / merged path: plain linear (no bias, no LoRA streams).
    y_plain = lora_linear(x, weight, None, None, None, 0.0,
                          compute_dtype=jnp.float32)
    y_plain = jax.block_until_ready(y_plain)
    assert jnp.allclose(y_plain, x @ weight.T, atol=1e-4, rtol=1e-4), \
        "plain-linear path mismatch"

    print("KERNEL_OK")
</pallas_src>

<mosaic_0001>
module attributes {stable_mosaic.version = 11 : i64} {
  func.func @kernel(%arg0: i32, %arg1: i32, %arg2: i32, %arg3: memref<16x128xf32, #tpu.memory_space<vmem>>, %arg4: memref<128x128xf32, #tpu.memory_space<vmem>>, %arg5: memref<16x8xf32, #tpu.memory_space<vmem>>, %arg6: memref<8x128xf32, #tpu.memory_space<vmem>>, %arg7: memref<1x128xf32, #tpu.memory_space<vmem>>, %arg8: memref<16x128xf32, #tpu.memory_space<vmem>>, %arg9: memref<16x128xf32, #tpu.memory_space<vmem>>) attributes {dimension_semantics = [#tpu.dimension_semantics<parallel>, #tpu.dimension_semantics<parallel>, #tpu.dimension_semantics<arbitrary>], iteration_bounds = array<i64: 1, 1, 1>, scalar_prefetch = 0 : i64, scratch_operands = 1 : i64, tpu.core_type = #tpu.core_type<tc>, window_params = [{transform_indices = @transform_0, window_bounds = array<i64: 16, 128>}, {transform_indices = @transform_1, window_bounds = array<i64: 128, 128>}, {transform_indices = @transform_2, window_bounds = array<i64: 16, 8>}, {transform_indices = @transform_3, window_bounds = array<i64: 8, 128>}, {transform_indices = @transform_4, window_bounds = array<i64: 1, 128>}, {transform_indices = @transform_5, window_bounds = array<i64: 16, 128>}]} {
    %c0_i32 = arith.constant 0 : i32
    %0 = arith.cmpi eq, %arg2, %c0_i32 : i32
    %1 = arith.extui %0 : i1 to i32
    %c0_i32_0 = arith.constant 0 : i32
    %2 = arith.cmpi ne, %1, %c0_i32_0 : i32
    scf.if %2 {
      %c0_10 = arith.constant 0 : index
      %c0_11 = arith.constant 0 : index
      %12 = vector.load %arg5[%c0_10, %c0_11] : memref<16x8xf32, #tpu.memory_space<vmem>>, vector<16x8xf32>
      %c0_12 = arith.constant 0 : index
      %c0_13 = arith.constant 0 : index
      %13 = vector.load %arg6[%c0_12, %c0_13] : memref<8x128xf32, #tpu.memory_space<vmem>>, vector<8x128xf32>
      %cst_14 = arith.constant dense<0.000000e+00> : vector<16x128xf32>
      %14 = tpu.matmul %12, %13, %cst_14 {dimension_numbers = #tpu.dot_dimension_numbers<[1], [0], [0], [1], [0, 0, 1, 1], [], []>} : vector<16x8xf32>, vector<8x128xf32>, vector<16x128xf32> -> vector<16x128xf32>
      %c0_15 = arith.constant 0 : index
      %c0_16 = arith.constant 0 : index
      %15 = vector.load %arg9[%c0_15, %c0_16] : memref<16x128xf32, #tpu.memory_space<vmem>>, vector<16x128xf32>
      tpu.vector_store %arg9[%c0_15, %c0_16], %14 {strides = array<i32>} : memref<16x128xf32, #tpu.memory_space<vmem>>, vector<16x128xf32>,
    } else {
    }
    %c0 = arith.constant 0 : index
    %c0_1 = arith.constant 0 : index
    %3 = vector.load %arg9[%c0, %c0_1] : memref<16x128xf32, #tpu.memory_space<vmem>>, vector<16x128xf32>
    %c0_2 = arith.constant 0 : index
    %c0_3 = arith.constant 0 : index
    %4 = vector.load %arg3[%c0_2, %c0_3] : memref<16x128xf32, #tpu.memory_space<vmem>>, vector<16x128xf32>
    %c0_4 = arith.constant 0 : index
    %c0_5 = arith.constant 0 : index
    %5 = vector.load %arg4[%c0_4, %c0_5] : memref<128x128xf32, #tpu.memory_space<vmem>>, vector<128x128xf32>
    %cst = arith.constant dense<0.000000e+00> : vector<16x128xf32>
    %6 = tpu.matmul %4, %5, %cst {dimension_numbers = #tpu.dot_dimension_numbers<[1], [1], [0], [0], [0, 0, 1, 0], [], []>} : vector<16x128xf32>, vector<128x128xf32>, vector<16x128xf32> -> vector<16x128xf32>
    %7 = arith.addf %3, %6 : vector<16x128xf32>
    %c0_6 = arith.constant 0 : index
    %c0_7 = arith.constant 0 : index
    %8 = vector.load %arg9[%c0_6, %c0_7] : memref<16x128xf32, #tpu.memory_space<vmem>>, vector<16x128xf32>
    tpu.vector_store %arg9[%c0_6, %c0_7], %7 {strides = array<i32>} : memref<16x128xf32, #tpu.memory_space<vmem>>, vector<16x128xf32>,
    %c0_i32_8 = arith.constant 0 : i32
    %9 = arith.cmpi eq, %arg2, %c0_i32_8 : i32
    %10 = arith.extui %9 : i1 to i32
    %c0_i32_9 = arith.constant 0 : i32
    %11 = arith.cmpi ne, %10, %c0_i32_9 : i32
    scf.if %11 {
      %c0_10 = arith.constant 0 : index
      %c0_11 = arith.constant 0 : index
      %12 = vector.load %arg9[%c0_10, %c0_11] : memref<16x128xf32, #tpu.memory_space<vmem>>, vector<16x128xf32>
      %c0_12 = arith.constant 0 : index
      %c0_13 = arith.constant 0 : index
      %13 = vector.load %arg7[%c0_12, %c0_13] : memref<1x128xf32, #tpu.memory_space<vmem>>, vector<1x128xf32>
      %14 = vector.broadcast %13 : vector<1x128xf32> to vector<16x128xf32>
      %15 = arith.addf %12, %14 : vector<16x128xf32>
      %c0_14 = arith.constant 0 : index
      %c0_15 = arith.constant 0 : index
      %16 = vector.load %arg8[%c0_14, %c0_15] : memref<16x128xf32, #tpu.memory_space<vmem>>, vector<16x128xf32>
      tpu.vector_store %arg8[%c0_14, %c0_15], %15 {strides = array<i32>} : memref<16x128xf32, #tpu.memory_space<vmem>>, vector<16x128xf32>,
    } else {
    }
    return
  }
  func.func @transform_0(%arg0: i32, %arg1: i32, %arg2: i32) -> (i32, i32) {
    %c0_i32 = arith.constant 0 : i32
    return %arg0, %arg2 : i32, i32
  }
  func.func @transform_1(%arg0: i32, %arg1: i32, %arg2: i32) -> (i32, i32) {
    %c0_i32 = arith.constant 0 : i32
    return %arg1, %arg2 : i32, i32
  }
  func.func @transform_2(%arg0: i32, %arg1: i32, %arg2: i32) -> (i32, i32) {
    %c0_i32 = arith.constant 0 : i32
    %c0_i32_0 = arith.constant 0 : i32
    return %arg0, %c0_i32 : i32, i32
  }
  func.func @transform_3(%arg0: i32, %arg1: i32, %arg2: i32) -> (i32, i32) {
    %c0_i32 = arith.constant 0 : i32
    %c0_i32_0 = arith.constant 0 : i32
    return %c0_i32, %arg1 : i32, i32
  }
  func.func @transform_4(%arg0: i32, %arg1: i32, %arg2: i32) -> (i32, i32) {
    %c0_i32 = arith.constant 0 : i32
    %c0_i32_0 = arith.constant 0 : i32
    return %c0_i32, %arg1 : i32, i32
  }
  func.func @transform_5(%arg0: i32, %arg1: i32, %arg2: i32) -> (i32, i32) {
    %c0_i32 = arith.constant 0 : i32
    return %arg0, %arg1 : i32, i32
  }
}

</mosaic_0001>

<bundles_post_ra>
// kernel: tpu_custom_call.1
= control target key start
LH: loop header
LB: loop body
LE: loop exit
PB: predicated region body
PF: predicated region fallthrough
CT: control target
= control target key end

     0   :  { %10 = vsyncpa [#allocation4], 0  ;;  %s490_s0 = inlined_call_operand.vmem [shape: f32[16,128], index: 0, kind: input, shape index: {}]   ;;  %s491_s1 = inlined_call_operand.hbm [shape: f32[128,128], index: 1, kind: input, shape index: {}]   ;;  %s492_s2 = inlined_call_operand.vmem [shape: f32[16,8], index: 2, kind: input, shape index: {}]   ;;  %s493_s3 = inlined_call_operand.vmem [shape: f32[8,128], index: 3, kind: input, shape index: {}]   ;;  %s494_s4 = inlined_call_operand.vmem [shape: f32[1,128], index: 4, kind: input, shape index: {}]   ;;  %s495_s5 = inlined_call_operand.hbm [shape: f32[16,128], index: 5, kind: output, shape index: {}]  }
   0x1   :  { %11 = vsyncpa [#allocation5], 0  ;;  %s408_s18 = smov [#allocation3]   ;;  %s360_s22 = scalar_lea.hbm %s491_s1, 2048 }
   0x2   :  { %s19_s19 = sshll.u32 %s408_s18, 4  ;;  %p361_p0 = scmp.ne.s32.totalorder %s491_s1, %s360_s22  ;;  %s20_s19 = int_to_ptr.vmem [resolvable:$true] %s19_s19 }
   0x3   :  { %p364_p1 = scmp.lt.u32.totalorder %s360_s22, %s491_s1 }
   0x5   :  { %p366_p2 = pnand %p364_p1, %p361_p0 }
   0x7   :  { %369 = shalt.err (!%p366_p2)
}
   0x8   :  { %s370_s27 = scalar_lea.vmem %s20_s19, 2048  ;;  %p375_p4 = scmp.lt.s32.totalorder %s20_s19, %s20_s19 }
   0x9   :  { %p371_p3 = scmp.ne.s32.totalorder %s20_s19, %s370_s27  ;;  %p376_p5 = scmp.lt.s32.totalorder %s370_s27, %s370_s27 }
   0xb   :  { %p377_p6 = por %p376_p5, %p375_p4 }
   0xd   :  { %p378_p7 = pnand %p377_p6, %p371_p3 }
   0xf   :  { %381 = shalt.err (!%p378_p7)
}
  0x10   :  { %s409_s28 = smov 128   ;;  %s410_s29 = smov 8  }
  0x11   :  { %25 = dma.hbm_to_vmem [thread:$0]  %s491_s1, 2048, %s20_s19, [#allocation4], %s409_s28, %s409_s28, %s410_s29  }
  0x12   :  { %404 = dma.done.wait [#allocation4], 2048  }
  0x13   :  { %405 = vsyncadd [#allocation4], 4294965248  ;;  %v130_v0 = vld [vmem:[#allocation3] sm:$0xff]  ;;  %v131_v1 = vld [vmem:[#allocation3 + $0x8] sm:$0xff]  ;;  %vm42_vm0 = vcmask 64512   ;;  %s411_s16 = smov [#allocation6]  }
  0x14   :  { %v132_v2 = vld [vmem:[#allocation3 + $0x10] sm:$0xff]  ;;  %v322_v3 = vpack.c.bf16 %v131_v1, %v130_v0  ;;  %v133_v4 = vld [vmem:[#allocation3 + $0x18] sm:$0xff]  ;;  %v134_v6 = vld [vmem:[#allocation3 + $0x20] sm:$0xff]  ;;  %s246_s17 = sshll.u32 %s411_s16, 4  ;;  %s247_s17 = int_to_ptr.vmem [resolvable:$true] %s246_s17 }
  0x15   :  { %v326_v5 = vpack.c.bf16 %v133_v4, %v132_v2  ;;  %v41_v7 = vld [vmem:[%s493_s3] sm:$0xff]  ;;  %v135_v9 = vld [vmem:[#allocation3 + $0x28] sm:$0xff]  ;;  %v136_v13 = vld [vmem:[#allocation3 + $0x30] sm:$0xff]  ;;  %s382_s18 = scalar_lea.vmem %s247_s17, 256  ;;  %p387_p9 = scmp.lt.s32.totalorder %s247_s17, %s247_s17 }
  0x16   :  { %323 = vmatprep.subr.bf16.mxu0 %v322_v3  ;;  %v39_v8 = vld [vmem:[%s492_s2] sm:$0xff]  ;;  %282 = vmatprep.subr.mxu1 %v41_v7  ;;  %v40_v10 = vld [vmem:[%s492_s2 + $0x8] sm:$0xff]  ;;  %v330_v12 = vpack.c.bf16 %v135_v9, %v134_v6  ;;  %v137_v14 = vld [vmem:[#allocation3 + $0x38] sm:$0xff]  ;;  %p383_p8 = scmp.ne.s32.totalorder %s247_s17, %s382_s18  ;;  %p388_p10 = scmp.lt.s32.totalorder %s382_s18, %s382_s18 }
  0x17   :  { %325 = vmatpush3.bf16.xpose.msra.mxu0 %v322_v3  ;;  %284 = vmatprep.mubr.msk.f32.mxu1 %vm42_vm0, %v39_v8  ;;  %v128_v11 = vld [vmem:[%s490_s0] sm:$0xff]  ;;  %v334_v15 = vpack.c.bf16 %v137_v14, %v136_v13  ;;  %v139_v17 = vld [vmem:[#allocation3 + $0x48] sm:$0xff]  ;;  %v140_v19 = vld [vmem:[#allocation3 + $0x50] sm:$0xff] }
  0x18   :  { %327 = vmatprep.subr.bf16.mxu0 %v326_v5  ;;  %283 = vmatpush3.msra.mxu1 %v41_v7  ;;  %v138_v16 = vld [vmem:[#allocation3 + $0x40] sm:$0xff]  ;;  %v141_v20 = vld [vmem:[#allocation3 + $0x58] sm:$0xff]  ;;  %v143_v23 = vld [vmem:[#allocation3 + $0x68] sm:$0xff]  ;;  %p389_p11 = por %p388_p10, %p387_p9 }
  0x19   :  { %319 = vmatprep.mubr.f32.mxu0 %v128_v11  ;;  %285 = vmatmul.mubr.msk.f32.vlgmr.msra.gmra.mrb[0].mxu1 %vm42_vm0, %v40_v10  ;;  %v338_v18 = vpack.c.bf16 %v139_v17, %v138_v16  ;;  %v342_v21 = vpack.c.bf16 %v141_v20, %v140_v19  ;;  %v142_v22 = vld [vmem:[#allocation3 + $0x60] sm:$0xff]  ;;  %v144_v25 = vld [vmem:[#allocation3 + $0x70] sm:$0xff]  ;;  %v145_v26 = vld [vmem:[#allocation3 + $0x78] sm:$0xff] }
  0x1a   :  { %v346_v24 = vpack.c.bf16 %v143_v23, %v142_v22  ;;  %v350_v27 = vpack.c.bf16 %v145_v26, %v144_v25  ;;  %v129_v28 = vld [vmem:[%s490_s0 + $0x8] sm:$0xff]  ;;  %v260_v32 = vld [vmem:[%s494_s4] ss:$0 sm:$0xff]  ;;  %p390_p12 = pnand %p389_p11, %p383_p8 }
  0x1f   :  { %329 = vmatpush3.bf16.xpose.msra.mxu0 %v326_v5 }
  0x20   :  { %331 = vmatprep.subr.bf16.mxu0 %v330_v12 }
  0x27   :  { %333 = vmatpush3.bf16.xpose.msra.mxu0 %v330_v12 }
  0x28   :  { %335 = vmatprep.subr.bf16.mxu0 %v334_v15 }
  0x2f   :  { %337 = vmatpush3.bf16.xpose.msra.mxu0 %v334_v15 }
  0x30   :  { %339 = vmatprep.subr.bf16.mxu0 %v338_v18 }
  0x37   :  { %341 = vmatpush3.bf16.xpose.msra.mxu0 %v338_v18 }
  0x38   :  { %343 = vmatprep.subr.bf16.mxu0 %v342_v21 }
  0x3f   :  { %345 = vmatpush3.bf16.xpose.msra.mxu0 %v342_v21 }
  0x40   :  { %347 = vmatprep.subr.bf16.mxu0 %v346_v24 }
  0x47   :  { %349 = vmatpush3.bf16.xpose.msra.mxu0 %v346_v24 }
  0x48   :  { %351 = vmatprep.subr.bf16.mxu0 %v350_v27 }
  0x4f   :  { %353 = vmatpush3.bf16.xpose.msra.mxu0 %v350_v27 }
  0x56   :  { %320 = vmatmul.mubr.f32.vlgmr.msra.gmra.mrb[0].mxu0 %v129_v28 }
  0xec   :  { %v286_v29 = vpop.f32.mrb[0].mxu1 }
  0xed   :  { %v115_v30 = vpop.f32.mrb[1].mxu1 }
 0x129   :  { %v321_v31 = vpop.f32.mrb[0].mxu0 }
 0x12a   :  { %v222_v33 = vadd.f32 %v321_v31, %v286_v29  ;;  %v212_v34 = vpop.f32.mrb[1].mxu0 }
 0x12b   :  { %v221_v35 = vadd.f32 %v212_v34, %v115_v30 }
 0x12c   :  { %v238_v36 = vadd.f32 %v260_v32, %v222_v33 }
 0x12d   :  { %v237_v37 = vadd.f32 %v260_v32, %v221_v35 }
 0x12e   :  { %240 = vst [vmem:[#allocation6 + $0x8] sm:$0xff] %v238_v36 }
 0x12f   :  { %239 = vst [vmem:[#allocation6] sm:$0xff] %v237_v37 }
 0x130   :  { %393 = shalt.err (!%p390_p12)
}
 0x131   :  { %s394_s4 = scalar_lea.hbm %s495_s5, 256 }
 0x132   :  { %p395_p13 = scmp.ne.s32.totalorder %s495_s5, %s394_s4  ;;  %p398_p0 = scmp.lt.u32.totalorder %s394_s4, %s495_s5 }
 0x134   :  { %p400_p1 = pnand %p398_p0, %p395_p13 }
 0x136   :  { %403 = shalt.err (!%p400_p1)
}
 0x137   :  { %252 = dma.vmem_to_hbm [thread:$0]  %s247_s17, 256, %s495_s5, [#allocation5], %s409_s28, %s409_s28, %s410_s29  }
 0x138   :  { %406 = dma.done.wait [#allocation5], 256  }
 0x139   :  { %407 = vsyncadd [#allocation5], 4294967040 }
 0x13a   :  { %256 = vsyncpa [#allocation4], 1 }
 0x13b   :  { %257 = vsyncpa [#allocation5], 1 }

</bundles_post_ra>
